<compile_context>
chip_gen: v7x
topology: tpu7x:2x2x1
jax: 0.10.0
libtpu: 0.0.40
codegen_flags: <defaults>
</compile_context>

<pallas_src>
import functools

import jax
import jax.numpy as jnp
from jax.experimental import pallas as pl
from jax.experimental.pallas import tpu as pltpu


def _label_smoothing_kernel(target_ref, pred_ref, out_ref, *,
                            confidence, smooth_val, num_classes, n_valid, tile_n):
    # target_ref: (TN, 1) int32, pred_ref: (TN, C), out_ref: (1, 128) f32
    pred = pred_ref[...]                                   # input dtype (bf16 stays bf16)
    tgt = target_ref[...]                                  # (TN, 1)
    C = pred.shape[-1]

    # Single shifted full-tile temporary; everything downstream is (TN, 1).
    m = jnp.max(pred, axis=-1, keepdims=True)              # (TN, 1)
    d = pred - m                                           # (TN, C)

    # Cross-lane reductions accumulate in f32 (keeps LSE accurate for bf16).
    log_z = jnp.log(jnp.sum(jnp.exp(d), axis=-1, keepdims=True,
                            dtype=jnp.float32))            # (TN, 1) = lse - m
    sum_d = jnp.sum(d, axis=-1, keepdims=True, dtype=jnp.float32)

    # pred[row, target[row]] - m via a broadcast one-hot compare + lane reduce.
    cls_ids = jax.lax.broadcasted_iota(jnp.int32, (1, C), 1)
    d_t = jnp.sum(jnp.where(cls_ids == tgt, d, 0.0), axis=-1, keepdims=True,
                  dtype=jnp.float32)                       # (TN, 1)

    # sum_c logp = sum_d - C*log_z ; logp_t = d_t - log_z   (row max cancels)
    loss_row = -(smooth_val * (sum_d - num_classes * log_z)
                 + (confidence - smooth_val) * (d_t - log_z))   # (TN, 1) f32

    # Mask rows of the ragged last block (undefined data beyond n_valid).
    row_ids = (pl.program_id(0) * tile_n
               + jax.lax.broadcasted_iota(jnp.int32, (tile_n, 1), 0))
    loss_row = jnp.where(row_ids < n_valid, loss_row, 0.0)

    partial = jnp.sum(loss_row)                            # block scalar (f32)

    # Lane-dense (1, 128) store: partial in lane 0, zeros elsewhere.
    lane_ids = jax.lax.broadcasted_iota(jnp.int32, (1, 128), 1)
    out_ref[...] = jnp.where(lane_ids == 0, partial, 0.0).astype(jnp.float32)


def _round_up(x, m):
    return ((x + m - 1) // m) * m


def label_smoothing_loss(pred, target, *, classes, smoothing=0.0, tile_n=None):
    """pred: (N, C) float (f32 or bf16), target: (N,) int. Returns scalar f32 loss."""
    confidence = 1.0 - smoothing
    smooth_val = smoothing / (classes - 1)

    N, C = pred.shape
    assert C == classes
    itemsize = pred.dtype.itemsize

    if tile_n is None:
        # Working-set budget ~40 MiB: 2x double-buffered pred tile plus ~3
        # f32-sized full-tile temporaries.  Safe on v7x (64 MiB physical VMEM)
        # and makes the per-step pred DMA several MiB (>> 0.35 us step
        # overhead) even for small C.
        budget = 40 * 1024 * 1024
        per_row = C * (2 * itemsize + 3 * 4)
        tile_n = max(8, (budget // per_row) // 8 * 8)

    if N <= 8:
        tile_n = N                       # single block equal to the full row dim
    else:
        # Keep >= 2 grid blocks so both v7x TensorCores get work ("parallel"
        # grid axis); costs at most one extra tiny step on v5e/v6e.
        half = _round_up(pl.cdiv(N, 2), 8)
        tile_n = max(8, min((tile_n // 8) * 8, half))

    num_blocks = pl.cdiv(N, tile_n)

    # VMEM cap derived from the chosen tile (double-buffered input + f32
    # temporaries + slack), clamped to a range valid on every generation.
    vmem_need = 2 * tile_n * C * itemsize + 3 * tile_n * C * 4 + (4 << 20)
    vmem_limit = int(max(32 << 20, min(48 << 20, vmem_need)))

    target2d = target.astype(jnp.int32).reshape(N, 1)

    kernel = functools.partial(
        _label_smoothing_kernel,
        confidence=float(confidence),
        smooth_val=float(smooth_val),
        num_classes=float(C),
        n_valid=N,
        tile_n=tile_n,
    )

    partials = pl.pallas_call(
        kernel,
        out_shape=jax.ShapeDtypeStruct((1, num_blocks * 128), jnp.float32),
        grid_spec=pltpu.PrefetchScalarGridSpec(
            num_scalar_prefetch=0,
            grid=(num_blocks,),
            in_specs=[
                pl.BlockSpec((tile_n, 1), lambda i: (i, 0)),   # target (tiny DMA)
                pl.BlockSpec((tile_n, C), lambda i: (i, 0)),   # pred (streamed once)
            ],
            out_specs=pl.BlockSpec((1, 128), lambda i: (0, i)),
        ),
        compiler_params=pltpu.CompilerParams(
            dimension_semantics=("parallel",),   # per-block partials keep v7x megacore
            vmem_limit_bytes=vmem_limit,
        ),
    )(target2d, pred)

    # Tiny final reduction over one lane-dense row (num_blocks * 128 floats).
    return jnp.sum(partials) / jnp.float32(N)


def _reference(pred, target, classes, smoothing):
    logp = jax.nn.log_softmax(pred.astype(jnp.float32), axis=-1)
    smooth_val = smoothing / (classes - 1)
    true_dist = jnp.full_like(logp, smooth_val)
    true_dist = true_dist.at[jnp.arange(pred.shape[0]), target].set(1.0 - smoothing)
    return jnp.mean(jnp.sum(-true_dist * logp, axis=-1))


if __name__ == "__main__":
    smoothing = 0.1
    key = jax.random.PRNGKey(0)
    k1, k2, k3, k4, k5, k6 = jax.random.split(key, 6)

    # Main small example: N=16 rows, C=128 classes (auto-tiling -> 2 blocks).
    N, C = 16, 128
    pred = jax.random.normal(k1, (N, C), dtype=jnp.float32)
    target = jax.random.randint(k2, (N,), 0, C, dtype=jnp.int32)

    loss = jax.block_until_ready(
        label_smoothing_loss(pred, target, classes=C, smoothing=smoothing))
    ref = _reference(pred, target, C, smoothing)
    assert jnp.allclose(loss, ref, atol=1e-4, rtol=1e-5), (loss, ref)

    # Ragged last block (N not a multiple of tile_n, no wrapper pad) plus the
    # multi-block lane-offset output path (forced tiny tile_n).
    N2 = 20
    pred2 = jax.random.normal(k3, (N2, C), dtype=jnp.float32)
    target2 = jax.random.randint(k4, (N2,), 0, C, dtype=jnp.int32)
    loss2 = jax.block_until_ready(
        label_smoothing_loss(pred2, target2, classes=C, smoothing=smoothing, tile_n=8))
    ref2 = _reference(pred2, target2, C, smoothing)
    assert jnp.allclose(loss2, ref2, atol=1e-4, rtol=1e-5), (loss2, ref2)

    # bf16 inputs: math stays bf16 on the wire and in the tile, reductions in f32.
    N3, C3 = 24, 96
    pred3 = jax.random.normal(k5, (N3, C3), dtype=jnp.bfloat16)
    target3 = jax.random.randint(k6, (N3,), 0, C3, dtype=jnp.int32)
    loss3 = jax.block_until_ready(
        label_smoothing_loss(pred3, target3, classes=C3, smoothing=smoothing))
    ref3 = _reference(pred3, target3, C3, smoothing)
    assert jnp.allclose(loss3, ref3, atol=5e-2, rtol=5e-2), (loss3, ref3)

    print("KERNEL_OK")
</pallas_src>

<mosaic_0001>
module attributes {stable_mosaic.version = 11 : i64} {
  func.func @_label_smoothing_kernel(%arg0: i32, %arg1: memref<8x1xi32, #tpu.memory_space<vmem>>, %arg2: memref<8x128xf32, #tpu.memory_space<vmem>>, %arg3: memref<1x128xf32, #tpu.memory_space<vmem>>) attributes {dimension_semantics = [#tpu.dimension_semantics<parallel>], iteration_bounds = array<i64: 2>, scalar_prefetch = 0 : i64, scratch_operands = 0 : i64, tpu.core_type = #tpu.core_type<tc>, window_params = [{transform_indices = @transform_0, window_bounds = array<i64: 8, 1>}, {transform_indices = @transform_1, window_bounds = array<i64: 8, 128>}, {transform_indices = @transform_2, window_bounds = array<i64: 1, 128>}]} {
    %c0 = arith.constant 0 : index
    %c0_0 = arith.constant 0 : index
    %0 = vector.load %arg2[%c0, %c0_0] : memref<8x128xf32, #tpu.memory_space<vmem>>, vector<8x128xf32>
    %c0_1 = arith.constant 0 : index
    %c0_2 = arith.constant 0 : index
    %1 = vector.load %arg1[%c0_1, %c0_2] : memref<8x1xi32, #tpu.memory_space<vmem>>, vector<8x1xi32>
    %cst = arith.constant dense<0xFF800000> : vector<8xf32>
    %2 = vector.multi_reduction <maximumf>, %0, %cst [1] : vector<8x128xf32> to vector<8xf32>
    %3 = vector.shape_cast %2 : vector<8xf32> to vector<8x1xf32>
    %4 = vector.broadcast %3 : vector<8x1xf32> to vector<8x128xf32>
    %5 = arith.subf %0, %4 : vector<8x128xf32>
    %6 = math.exp %5 : vector<8x128xf32>
    %cst_3 = arith.constant dense<0.000000e+00> : vector<8xf32>
    %7 = vector.multi_reduction <add>, %6, %cst_3 [1] : vector<8x128xf32> to vector<8xf32>
    %8 = vector.shape_cast %7 : vector<8xf32> to vector<8x1xf32>
    %9 = math.log %8 : vector<8x1xf32>
    %cst_4 = arith.constant dense<0.000000e+00> : vector<8xf32>
    %10 = vector.multi_reduction <add>, %5, %cst_4 [1] : vector<8x128xf32> to vector<8xf32>
    %11 = vector.shape_cast %10 : vector<8xf32> to vector<8x1xf32>
    %12 = tpu.iota {dimensions = array<i32: 1>} : vector<1x128xi32>
    %13 = vector.broadcast %12 : vector<1x128xi32> to vector<8x128xi32>
    %14 = vector.broadcast %1 : vector<8x1xi32> to vector<8x128xi32>
    %15 = arith.cmpi eq, %13, %14 : vector<8x128xi32>
    %cst_5 = arith.constant 0.000000e+00 : f32
    %16 = vector.broadcast %cst_5 : f32 to vector<8x128xf32>
    %17 = arith.select %15, %5, %16 : vector<8x128xi1>, vector<8x128xf32>
    %cst_6 = arith.constant dense<0.000000e+00> : vector<8xf32>
    %18 = vector.multi_reduction <add>, %17, %cst_6 [1] : vector<8x128xf32> to vector<8xf32>
    %19 = vector.shape_cast %18 : vector<8xf32> to vector<8x1xf32>
    %cst_7 = arith.constant 1.280000e+02 : f32
    %20 = vector.broadcast %cst_7 : f32 to vector<8x1xf32>
    %21 = arith.mulf %20, %9 : vector<8x1xf32>
    %22 = arith.subf %11, %21 : vector<8x1xf32>
    %cst_8 = arith.constant 7.87401571E-4 : f32
    %23 = vector.broadcast %cst_8 : f32 to vector<8x1xf32>
    %24 = arith.mulf %23, %22 : vector<8x1xf32>
    %25 = arith.subf %19, %9 : vector<8x1xf32>
    %cst_9 = arith.constant 0.899212599 : f32
    %26 = vector.broadcast %cst_9 : f32 to vector<8x1xf32>
    %27 = arith.mulf %26, %25 : vector<8x1xf32>
    %28 = arith.addf %24, %27 : vector<8x1xf32>
    %cst_10 = arith.constant 0.000000e+00 : f32
    %29 = vector.broadcast %cst_10 : f32 to vector<8x1xf32>
    %30 = arith.subf %29, %28 : vector<8x1xf32>
    %c8_i32 = arith.constant 8 : i32
    %31 = arith.muli %arg0, %c8_i32 : i32
    %32 = tpu.iota {dimensions = array<i32: 0>} : vector<8x1xi32>
    %33 = vector.broadcast %31 : i32 to vector<8x1xi32>
    %34 = arith.addi %33, %32 : vector<8x1xi32>
    %c16_i32 = arith.constant 16 : i32
    %35 = vector.broadcast %c16_i32 : i32 to vector<8x1xi32>
    %36 = arith.cmpi slt, %34, %35 : vector<8x1xi32>
    %cst_11 = arith.constant 0.000000e+00 : f32
    %37 = vector.broadcast %cst_11 : f32 to vector<8x1xf32>
    %38 = arith.select %36, %30, %37 : vector<8x1xi1>, vector<8x1xf32>
    %39 = vector.shape_cast %38 : vector<8x1xf32> to vector<1x8x1xf32>
    %cst_12 = arith.constant dense<0.000000e+00> : vector<1xf32>
    %40 = vector.multi_reduction <add>, %39, %cst_12 [1, 2] : vector<1x8x1xf32> to vector<1xf32>
    %41 = vector.shape_cast %40 : vector<1xf32> to vector<1x1x1xf32>
    %42 = vector.extract %41[0, 0, 0] : f32 from vector<1x1x1xf32>
    %43 = tpu.iota {dimensions = array<i32: 1>} : vector<1x128xi32>
    %c0_i32 = arith.constant 0 : i32
    %44 = vector.broadcast %c0_i32 : i32 to vector<1x128xi32>
    %45 = arith.cmpi eq, %43, %44 : vector<1x128xi32>
    %cst_13 = arith.constant 0.000000e+00 : f32
    %46 = vector.broadcast %42 : f32 to vector<1x128xf32>
    %47 = vector.broadcast %cst_13 : f32 to vector<1x128xf32>
    %48 = arith.select %45, %46, %47 : vector<1x128xi1>, vector<1x128xf32>
    %c0_14 = arith.constant 0 : index
    %c0_15 = arith.constant 0 : index
    %49 = vector.load %arg3[%c0_14, %c0_15] : memref<1x128xf32, #tpu.memory_space<vmem>>, vector<1x128xf32>
    tpu.vector_store %arg3[%c0_14, %c0_15], %48 {strides = array<i32>} : memref<1x128xf32, #tpu.memory_space<vmem>>, vector<1x128xf32>,
    return
  }
  func.func @transform_0(%arg0: i32) -> (i32, i32) {
    %c0_i32 = arith.constant 0 : i32
    %c0_i32_0 = arith.constant 0 : i32
    return %arg0, %c0_i32 : i32, i32
  }
  func.func @transform_1(%arg0: i32) -> (i32, i32) {
    %c0_i32 = arith.constant 0 : i32
    %c0_i32_0 = arith.constant 0 : i32
    return %arg0, %c0_i32 : i32, i32
  }
  func.func @transform_2(%arg0: i32) -> (i32, i32) {
    %c0_i32 = arith.constant 0 : i32
    %c0_i32_0 = arith.constant 0 : i32
    return %c0_i32, %arg0 : i32, i32
  }
}

</mosaic_0001>

<bundles_post_ra>
// kernel: tpu_custom_call.1
= control target key start
LH: loop header
LB: loop body
LE: loop exit
PB: predicated region body
PF: predicated region fallthrough
CT: control target
= control target key end

     0   :  { %7 = vsyncpa [#allocation3], 0  ;;  %s528_s0 = inlined_call_operand.vmem [shape: s32[16,1], index: 0, kind: input, shape index: {}]   ;;  %s529_s1 = inlined_call_operand.vmem [shape: f32[16,128], index: 1, kind: input, shape index: {}]   ;;  %s530_s2 = inlined_call_operand.hbm [shape: f32[1,256], index: 2, kind: output, shape index: {}]  }
   0x1   :  { %9 = vsyncpa [#allocation3 + $0x1], 0  ;;  %s424_s9 = smov 0   ;;  %s426_s10 = smov 0  }
   0x2   :  { %s428_s11 = smov 0   ;;  %s430_s12 = smov 0  }
   0x3 LB: > { %s445_s13 = sadd.s32 4294967295, %s405_s12   ;;  %s286_s14 = sadd.s32 4294967294, %s405_s12   ;;  %s405_s12 = sphi %s430_s12, %s536_s12   ;;  %s401_s11 = sphi %s428_s11, %s535_s11   ;;  %s397_s10 = sphi %s426_s10, %s534_s10   ;;  %s393_s9 = sphi %s424_s9, %s533_s9  }
   0x4   : > { %s449_s15 = sadd.s32 1, %s405_s12   ;;  %s74_s16 = sadd.s32 1, %s401_s11 }
   0x5   : > { %s71_s17 = ssub.s32 %s405_s12, %s449_s15  ;;  %p84_p0 = scmp.ne.s32.totalorder %s401_s11, %s397_s10 }
   0x6   : > { %p72_p1 = scmp.eq.s32.totalorder %s71_s17, 0  ;;  %p85_p2 = scmp.eq.s32.totalorder %s445_s13, 1 }
   0x7   : > { %p90_p3 = scmp.ne.s32.totalorder %s397_s10, %s393_s9  ;;  %p91_p4 = scmp.eq.s32.totalorder %s286_s14, 1 }
   0x8   : > { %s460_s18 = scalar_select %p72_p1, %s401_s11, %s74_s16  }
   0x9   : > { %p462_p5 = por %p85_p2, %p84_p0  ;;  %p466_p6 = por %p91_p4, %p90_p3 }
   0xa   : > { %p289_p7 = scmp.ge.s32.totalorder %s405_s12, 1  ;;  %p123_p8 = scmp.lt.s32.totalorder %s405_s12, 3 }
   0xc   : > { %p124_p9 = pnand %p289_p7, %p123_p8 }
   0xd   : > { %p147_p10 = scmp.lt.s32.totalorder (!%p124_p9), %s445_s13, 1  ;;  %v407_v0 = vmov (!%p124_p9), 0   ;;  %v168_v6 = vlaneseq (!%p124_p9)  ;;  %s292_s29 = sshll.u32 (!%p124_p9), %s445_s13, 3  ;;  %vm191_vm2 = vcmask (!%p124_p9), 7168  }
   0xe   : > { %127 = sbr.rel (%p124_p9) target bundleno = 570 (0x23a), region = 28  ;;  %338 = vset.pattern.permute.xlu0 (!%p124_p9), %v407_v0  ;;  %v187_v19 = vstv (!%p124_p9), %s292_s29  ;;  %s145_s30 = sand.u32 (!%p124_p9), 1, %s397_s10  }
   0xf   : > { %v169_v8 = vand.u32 (!%p124_p9), 127, %v168_v6  ;;  %v186_v16 = vshrl.u32 (!%p124_p9), %v168_v6, 7  ;;  %s293_s3 = sshll.u32 (!%p124_p9), %s445_s13, 4  ;;  %s146_s4 = scalar_lea.vmem (!%p124_p9), [#allocation2], %s145_s30 }
  0x10   : > { %s219_s5 = sshll.u32 (!%p124_p9), %s146_s4, 4  ;;  %s486_s14 = scalar_lea.hbm (!%p124_p9), %s530_s2, %s293_s3  ;;  %s488_s5 = int_to_ptr.vmem [resolvable:$true] %s219_s5 }
  0x11   : > { %v188_v21 = vadd.s32 (!%p124_p9), %v187_v19, %v186_v16  ;;  %vm202_vm3 = vcmp.eq.s32.totalorder (!%p124_p9), %v169_v8, 0  ;;  %s207_s16 = scalar_lea.sflag (!%p124_p9), [#allocation3], %s145_s30  ;;  %s343_s17 = scalar_lea.vmem (!%p124_p9), %s488_s5, 16 }
  0x12   : > { %p344_p11 = scmp.ne.s32.totalorder (!%p124_p9), %s488_s5, %s343_s17 }
  0x13   : > { %vm189_vm1 = vcmp.lt.s32.totalorder (!%p124_p9), %v188_v21, 16 }
  0x14   : > { %p345_p12 = pnand (!%p124_p9), %p344_p11, %p462_p5 }
  0x15   : > { %s148_s21 = scalar_select %p147_p10, %s445_s13, 1 }
  0x16   : > { %p346_p13 = pneg %p345_p12  ;;  %s408_s13 = smov [#allocation2]  }
  0x17   : > { %s290_s22 = sshll.u32 %s148_s21, 3  ;;  %s347_s21 = sshll.u32 %s408_s13, 4  ;;  %s348_s21 = int_to_ptr.vmem [resolvable:$false] %s347_s21 }
  0x18   : > { %s154_s25 = scalar_lea.vmem %s529_s1, %s290_s22  ;;  %s150_s28 = scalar_lea.vmem %s528_s0, %s290_s22 }
  0x19   : > { %v155_v1 = vld [vmem:[%s154_s25] sm:$0xff]  ;;  %s349_s22 = scalar_lea.vmem %s348_s21, 32  ;;  %p350_p0 = scmp.lt.s32.totalorder %s488_s5, %s348_s21 }
  0x1a   : > { %157 = vmax.xlane.f32.xlu0 %v155_v1  ;;  %v156_v2 = vld [vmem:[%s150_s28] sm:$0xff]  ;;  %p351_p1 = scmp.lt.s32.totalorder %s349_s22, %s343_s17 }
  0x1c   : > { %p352_p2 = por %p351_p1, %p350_p0 }
  0x1e   : > { %p353_p3 = pnand %p352_p2, %p346_p13 }
  0x30   : > { %171 = vperm.xlu0 %338, %v156_v2  }
  0xa7   : > { %v158_v3 = vpop.xlane.xlu0 %157 }
  0xa8   : > { %v159_v4 = vsub.f32 %v155_v1, %v158_v3 }
  0xaa   : > { %v160_v5 = vmul.f32 1.442695, %v159_v4 }
  0xac   : > { %339 = vpow2.f32 %v160_v5 }
  0xaf   : > { %v172_v9 = vpop.permute.xlu0 %171 }
  0xb0   : > { %vm173_vm0 = vcmp.eq.s32.totalorder %v169_v8, %v172_v9 }
  0xb1   : > { %v174_v10 = vsel %vm173_vm0, %v159_v4, 0.0 }
  0xb6   : > { %v340_v7 = vpop.eup %339 }
  0xb7   : > { %162 = vadd.xlane.f32.xlu1 %v340_v7 }
  0xbb   : > { %166 = vadd.xlane.f32.xlu1 %v159_v4 }
  0xbf   : > { %175 = vadd.xlane.f32.xlu1 %v174_v10 }
 0x144   : > { %v163_v11 = vpop.xlane.xlu1 %162 }
 0x145   : > { %341 = vlog2.f32 %v163_v11 }
 0x148   : > { %v167_v12 = vpop.xlane.xlu1 %166 }
 0x14c   : > { %v176_v15 = vpop.xlane.xlu1 %175 }
 0x14f   : > { %v342_v13 = vpop.eup %341 }
 0x150   : > { %v165_v14 = vmul.f32 0.6931472, %v342_v13 }
 0x152   : > { %v177_v17 = vmul.f32 128.0, %v165_v14  ;;  %v180_v18 = vsub.f32 %v176_v15, %v165_v14 }
 0x154   : > { %v178_v20 = vsub.f32 %v167_v12, %v177_v17  ;;  %v181_v23 = vmul.f32 0.8992126, %v180_v18 }
 0x156   : > { %v179_v22 = vmul.f32 0.0007874016, %v178_v20 }
 0x158   : > { %v182_v24 = vadd.f32 %v181_v23, %v179_v22 }
 0x15a   : > { %v183_v25 = vsub.f32 0.0, %v182_v24 }
 0x15c   : > { %v190_v26 = vsel %vm189_vm1, %v183_v25, 0.0 }
 0x15d   : > { %v192_v27 = vsel %vm191_vm2, %v190_v26, 0.0 }
 0x15e   : > { %193 = vadd.xlane.f32.xlu1 %v192_v27 }
 0x1eb   : > { %v194_v28 = vpop.xlane.xlu1 %193 }
 0x1ec   : > { %v195_v29 = vrot.slane %v194_v28, 4 }
 0x1ee   : > { %v196_v30 = vadd.f32 %v195_v29, %v194_v28 }
 0x1f0   : > { %v197_v31 = vrot.slane %v196_v30, 2 }
 0x1f2   : > { %v198_v32 = vadd.f32 %v197_v31, %v196_v30 }
 0x1f4   : > { %v199_v33 = vrot.slane %v198_v32, 1 }
 0x1f6   : > { %v200_v34 = vadd.f32 %v199_v33, %v198_v32 }
 0x1f8   : > { %296 = vpush %v200_v34 }
 0x229   : > { %s297_s6 = spop %296 }
 0x22a   : > { %v203_v35 = vstv %s297_s6 }
 0x22b   : > { %v204_v36 = vsel %vm202_vm3, %v203_v35, 0.0 }
 0x22c   : > { %205 = vst [vmem:[%s146_s4] sm:$0x1] %v204_v36 }
 0x22d   : > { %356 = shalt.err (!%p353_p3)
}
 0x22e   : > { %s357_s23 = scalar_lea.hbm %s486_s14, 16  ;;  %s361_s26 = scalar_lea.hbm %s530_s2, 32 }
 0x22f   : > { %p358_p4 = scmp.ne.s32.totalorder %s486_s14, %s357_s23  ;;  %p362_p9 = scmp.lt.u32.totalorder %s486_s14, %s530_s2 }
 0x230   : > { %p363_p10 = scmp.lt.u32.totalorder %s361_s26, %s357_s23  ;;  %p365_p12 = scmp.lt.u32.totalorder %s357_s23, %s486_s14 }
 0x231   : > { %p359_p7 = pnand %p358_p4, %p462_p5 }
 0x232   : > { %p364_p11 = por %p363_p10, %p362_p9 }
 0x233   : > { %p360_p8 = pneg %p359_p7 }
 0x234   : > { %p366_p13 = por %p365_p12, %p364_p11 }
 0x236   : > { %p367_p0 = pnand %p366_p13, %p360_p8 }
 0x238   : > { %370 = shalt.err (!%p367_p0)
}
 0x239   : > { %298 = dma.vmem_to_hbm [thread:$0]  (%p462_p5), %s488_s5, 16, %s486_s14, %s207_s16  }
 0x23a PF: > { %p304_p1 = scmp.ge.s32.totalorder %s405_s12, 2  ;;  %s231_s29 = sand.u32 1, %s393_s9  }
 0x23b   : > { %s232_s30 = scalar_lea.sflag [#allocation3], %s231_s29 }
 0x23c   : > { %p301_p2 = pnand %p304_p1, %p466_p6 }
 0x23e   : > { %388 = dma.done.wait (!%p301_p2), %s232_s30, 16  }
 0x23f   : > { %390 = vsyncadd (!%p301_p2), %s232_s30, 4294967280  ;;  %p12_p3 = scmp.ge.s32.totalorder %s449_s15, 4   ;;  %s533_s9 = smov %s397_s10 }
 0x240   : > { %s534_s10 = smov %s401_s11  ;;  %s535_s11 = smov %s460_s18 }
 0x241   : > { %s536_s12 = smov %s449_s15  ;;  %14 = sbr.rel (!%p12_p3) target bundleno = 3 (0x3), region = 66 }
 0x248   :  { %236 = vsyncpa [#allocation3], 1 }
 0x249   :  { %238 = vsyncpa [#allocation3 + $0x1], 1 }

</bundles_post_ra>
